<compile_context>
chip_gen: v6e
topology: v6e:2x2x1
jax: 0.10.0
libtpu: 0.0.40
codegen_flags: <defaults>
</compile_context>

<pallas_src>
import jax
import jax.numpy as jnp
from jax.experimental import pallas as pl
from jax.experimental.pallas import tpu as pltpu


def _linear_kernel(w_ref, b_ref, x_ref, o_ref):
    # w_ref: (2,) SMEM scalars, b_ref: (1,) SMEM scalar
    # x_ref: (2, TB) VMEM  -- batch on the lane axis
    # o_ref: (1, TB) VMEM  -- lane-dense output
    w0 = w_ref[0]
    w1 = w_ref[1]
    b = b_ref[0]
    # Two VPU FMAs + broadcasted bias add; no MXU, no result-FIFO drain.
    o_ref[...] = w0 * x_ref[0:1, :] + w1 * x_ref[1:2, :] + b


def linear_forward(x, weight, bias, *, tile_b=1024):
    """y = x @ weight.T + bias  (torch.nn.Linear(2, 1) forward).

    x:      (B, 2)  float32
    weight: (1, 2)  float32  (PyTorch convention)
    bias:   (1,)    float32
    """
    B, Fin = x.shape
    Fout = weight.shape[0]
    assert Fin == 2 and Fout == 1

    # Lane-dense layout: pad batch up to the lane width (or tile multiple).
    lane = 128
    Bp = ((B + lane - 1) // lane) * lane
    if Bp > tile_b:
        TB = tile_b
        Bp = ((B + TB - 1) // TB) * TB
    else:
        TB = Bp
    num_tiles = Bp // TB

    xt = jnp.zeros((Fin, Bp), jnp.float32).at[:, :B].set(x.T.astype(jnp.float32))
    w_flat = weight.reshape(Fin).astype(jnp.float32)   # row of nn.Linear weight; no transpose
    b_flat = bias.reshape(Fout).astype(jnp.float32)

    smem_spec = pl.BlockSpec(memory_space=pltpu.MemorySpace.SMEM)
    out_shape = jax.ShapeDtypeStruct((1, Bp), jnp.float32)

    if num_tiles == 1:
        # Single block, no grid: avoids the ~0.35us per-grid-step pipelining
        # overhead and needless double buffers for a tiny problem.
        yt = pl.pallas_call(
            _linear_kernel,
            out_shape=out_shape,
            in_specs=[smem_spec, smem_spec,
                      pl.BlockSpec(memory_space=pltpu.MemorySpace.VMEM)],
            out_specs=pl.BlockSpec(memory_space=pltpu.MemorySpace.VMEM),
        )(w_flat, b_flat, xt)
    else:
        # Large batch: tile over the lane axis; parallel axis lets v7x's two
        # TensorCores each take half of the grid.
        yt = pl.pallas_call(
            _linear_kernel,
            out_shape=out_shape,
            grid=(num_tiles,),
            in_specs=[smem_spec, smem_spec,
                      pl.BlockSpec((Fin, TB), lambda i: (0, i))],
            out_specs=pl.BlockSpec((1, TB), lambda i: (0, i)),
            compiler_params=pltpu.CompilerParams(
                dimension_semantics=("parallel",)),
        )(w_flat, b_flat, xt)

    return yt[0, :B].reshape(B, Fout).astype(x.dtype)


if __name__ == "__main__":
    key = jax.random.PRNGKey(0)
    kx, kw, kb = jax.random.split(key, 3)

    B, FIN, FOUT = 8, 2, 1
    x = jax.random.normal(kx, (B, FIN), dtype=jnp.float32)

    # Deterministic parameter init (PyTorch Linear(2,1) shapes: weight (1,2), bias (1,))
    bound = 1.0 / jnp.sqrt(jnp.float32(FIN))
    weight = jax.random.uniform(kw, (FOUT, FIN), minval=-bound, maxval=bound,
                                dtype=jnp.float32)
    bias = jax.random.uniform(kb, (FOUT,), minval=-bound, maxval=bound,
                              dtype=jnp.float32)

    y = linear_forward(x, weight, bias)
    y = jax.block_until_ready(y)

    # Correctness check against plain-JAX reference.
    y_ref = x @ weight.T + bias
    assert y.shape == (B, FOUT)
    assert jnp.allclose(y, y_ref, atol=1e-5, rtol=1e-5)

    print("KERNEL_OK")
</pallas_src>

<mosaic_0001>
module attributes {stable_mosaic.version = 11 : i64} {
  func.func @_linear_kernel(%arg0: memref<2xf32, #tpu.memory_space<smem>>, %arg1: memref<1xf32, #tpu.memory_space<smem>>, %arg2: memref<2x128xf32, #tpu.memory_space<vmem>>, %arg3: memref<1x128xf32, #tpu.memory_space<vmem>>) attributes {dimension_semantics = [], scalar_prefetch = 0 : i64, scratch_operands = 0 : i64, tpu.core_type = #tpu.core_type<tc>} {
    %c0 = arith.constant 0 : index
    %0 = memref.load %arg0[%c0] : memref<2xf32, #tpu.memory_space<smem>>
    %c1 = arith.constant 1 : index
    %1 = memref.load %arg0[%c1] : memref<2xf32, #tpu.memory_space<smem>>
    %c0_0 = arith.constant 0 : index
    %2 = memref.load %arg1[%c0_0] : memref<1xf32, #tpu.memory_space<smem>>
    %c0_1 = arith.constant 0 : index
    %c0_2 = arith.constant 0 : index
    %3 = vector.load %arg2[%c0_1, %c0_2] : memref<2x128xf32, #tpu.memory_space<vmem>>, vector<1x128xf32>
    %4 = vector.broadcast %0 : f32 to vector<1x128xf32>
    %5 = arith.mulf %4, %3 : vector<1x128xf32>
    %c1_3 = arith.constant 1 : index
    %c0_4 = arith.constant 0 : index
    %6 = vector.load %arg2[%c1_3, %c0_4] : memref<2x128xf32, #tpu.memory_space<vmem>>, vector<1x128xf32>
    %7 = vector.broadcast %1 : f32 to vector<1x128xf32>
    %8 = arith.mulf %7, %6 : vector<1x128xf32>
    %9 = arith.addf %5, %8 : vector<1x128xf32>
    %10 = vector.broadcast %2 : f32 to vector<1x128xf32>
    %11 = arith.addf %9, %10 : vector<1x128xf32>
    %c0_5 = arith.constant 0 : index
    %c0_6 = arith.constant 0 : index
    %12 = vector.load %arg3[%c0_5, %c0_6] : memref<1x128xf32, #tpu.memory_space<vmem>>, vector<1x128xf32>
    tpu.vector_store %arg3[%c0_5, %c0_6], %11 {strides = array<i32>} : memref<1x128xf32, #tpu.memory_space<vmem>>, vector<1x128xf32>,
    return
  }
}

</mosaic_0001>

<bundles_post_ra>
// kernel: tpu_custom_call.1
= control target key start
LH: loop header
LB: loop body
LE: loop exit
PB: predicated region body
PF: predicated region fallthrough
CT: control target
= control target key end

     0   :  { %9 = vsyncpa [#allocation5], 0  ;;  %s133_s0 = inlined_call_operand.vmem [shape: f32[2], index: 0, kind: input, shape index: {}]   ;;  %s134_s1 = inlined_call_operand.<no memory space> [shape: f32[1], index: 1, kind: input, shape index: {}]   ;;  %s135_s2 = inlined_call_operand.vmem [shape: f32[2,128], index: 2, kind: input, shape index: {}]   ;;  %s136_s3 = inlined_call_operand.hbm [shape: f32[1,128], index: 3, kind: output, shape index: {}]  }
   0x1   :  { %10 = vsyncpa [#allocation4], 0  ;;  %s17_s14 = sshll.u32 %s133_s0, 4  ;;  %s18_s14 = int_to_ptr.vmem [resolvable:$true] %s17_s14 }
   0x2   :  { %s60_s15 = scalar_lea.vmem %s18_s14, 16  ;;  %p65_p1 = scmp.lt.s32.totalorder %s18_s14, %s18_s14 }
   0x3   :  { %p61_p0 = scmp.ne.s32.totalorder %s18_s14, %s60_s15  ;;  %p66_p2 = scmp.lt.s32.totalorder %s60_s15, %s60_s15 }
   0x5   :  { %p67_p3 = por %p66_p2, %p65_p1 }
   0x7   :  { %p68_p4 = pnand %p67_p3, %p61_p0 }
   0x9   :  { %71 = shalt.err (!%p68_p4)
}
   0xa   :  { %s96_s16 = smov [#allocation3]  }
   0xb   :  { %20 = dma.vmem_to_smem %s18_s14, 16, %s96_s16, [#allocation5]  }
   0xc   :  { %92 = dma.done.wait [#allocation5], 16  }
   0xd   :  { %93 = vsyncadd [#allocation5], 4294967280 }
   0xe   :  { %28 = sfence }
   0xf   :  { %s29_s17 = sld [smem:[#allocation3]]  ;;  %v32_v0 = vld [vmem:[%s135_s2] sm:$0x1]  ;;  %v35_v1 = vld [vmem:[%s135_s2 + $0x1] sm:$0x1]  ;;  %v39_v6 = vstv %s134_s1  ;;  %s97_s24 = smov [#allocation6]  }
  0x10   :  { %s57_s18 = sld [smem:[#allocation3 + $0x1]]  ;;  %s48_s25 = sshll.u32 %s97_s24, 4  ;;  %s49_s25 = int_to_ptr.vmem [resolvable:$true] %s48_s25 }
  0x11   :  { %s72_s26 = scalar_lea.vmem %s49_s25, 16  ;;  %s76_s27 = scalar_lea.vmem %s49_s25, 32 }
  0x12   :  { %p73_p5 = scmp.ne.s32.totalorder %s49_s25, %s72_s26  ;;  %p77_p6 = scmp.lt.s32.totalorder %s49_s25, %s49_s25 }
  0x13   :  { %p78_p7 = scmp.lt.s32.totalorder %s76_s27, %s72_s26 }
  0x15   :  { %v33_v2 = vstv %s29_s17  ;;  %p79_p8 = por %p78_p7, %p77_p6 }
  0x16   :  { %v34_v3 = vmul.f32 %v33_v2, %v32_v0  ;;  %v36_v4 = vstv %s57_s18 }
  0x17   :  { %v37_v5 = vmul.f32 %v36_v4, %v35_v1  ;;  %p80_p9 = pnand %p79_p8, %p73_p5 }
  0x19   :  { %v38_v7 = vadd.f32 %v37_v5, %v34_v3 }
  0x1b   :  { %v40_v8 = vadd.f32 %v39_v6, %v38_v7 }
  0x1d   :  { %41 = vst [vmem:[#allocation6] sm:$0x1] %v40_v8 }
  0x1e   :  { %83 = shalt.err (!%p80_p9)
}
  0x1f   :  { %51 = dma.vmem_to_hbm [thread:$0]  %s49_s25, 16, %s136_s3, [#allocation4]  }
  0x20   :  { %94 = dma.done.wait [#allocation4], 16  }
  0x21   :  { %95 = vsyncadd [#allocation4], 4294967280 }
  0x22   :  { %55 = vsyncpa [#allocation4], 1 }
  0x23   :  { %56 = vsyncpa [#allocation5], 1 }

</bundles_post_ra>
